<compile_context>
chip_gen: v5e
topology: v5e:2x2
jax: 0.10.0
libtpu: 0.0.40
codegen_flags: <defaults>
</compile_context>

<pallas_src>
import jax
import jax.numpy as jnp
from jax.experimental import pallas as pl
from jax.experimental.pallas import tpu as pltpu

# ---- Config equivalents (Config.* in the reference code) --------------------
EMBEDDING_DIM = 32
NUM_FILTERS = 4
KERNEL_SIZE = 3
BN_EPS = 1e-5
E_TILE_MAX = 4096     # entity rows per score-kernel grid step


def _round_up(x, m):
    return -(-x // m) * m


# =============================== Pallas kernel ===============================
def _score_kernel(p_ref, c_ref, e2_ref, out_ref):
    """Folded DistMult score for one tile of raw entity embeddings.

    p_ref  : (B_pad, 32)     bf16  P = prod @ W_ent^T   (resident across grid)
    c_ref  : (B_pad, 1)      f32   c = prod @ b_ent     (resident)
    e2_ref : (E_tile, 32)    bf16  streamed raw entity embeddings
    out_ref: (B_pad, E_tile) f32
    """
    s = jax.lax.dot_general(
        p_ref[...], e2_ref[...],
        dimension_numbers=(((1,), (1,)), ((), ())),
        preferred_element_type=jnp.float32)              # (B_pad, E_tile)
    out_ref[...] = jax.nn.sigmoid(s + c_ref[...])


def score(p_bf16, c, emb_e_bf16, e_tile):
    B_pad, D = p_bf16.shape
    E_pad = emb_e_bf16.shape[0]
    grid = (E_pad // e_tile,)
    return pl.pallas_call(
        _score_kernel,
        out_shape=jax.ShapeDtypeStruct((B_pad, E_pad), jnp.float32),
        grid=grid,
        in_specs=[
            pl.BlockSpec((B_pad, D), lambda i: (0, 0)),     # P (tiny, resident)
            pl.BlockSpec((B_pad, 1), lambda i: (0, 0)),     # c (tiny, resident)
            pl.BlockSpec((e_tile, D), lambda i: (i, 0)),    # streamed bf16 embeddings
        ],
        out_specs=pl.BlockSpec((B_pad, e_tile), lambda i: (0, i)),
        compiler_params=pltpu.CompilerParams(
            dimension_semantics=("parallel",)),
    )(p_bf16, c, emb_e_bf16)


# ============================ Parameter handling =============================
def init_params(key, num_entities, num_relations):
    k1, k2, k3, k4 = jax.random.split(key, 4)

    def xavier_normal(k, shape, fan_in, fan_out):
        std = (2.0 / (fan_in + fan_out)) ** 0.5
        return (std * jax.random.normal(k, shape)).astype(jnp.float32)

    def bn_default(c):
        # (gamma, beta, running_mean, running_var) — eval-mode defaults.
        return (jnp.ones((c,), jnp.float32), jnp.zeros((c,), jnp.float32),
                jnp.zeros((c,), jnp.float32), jnp.ones((c,), jnp.float32))

    D, F, K = EMBEDDING_DIM, NUM_FILTERS, KERNEL_SIZE
    return dict(
        emb_e=xavier_normal(k1, (num_entities, D), D, num_entities),
        emb_rel=xavier_normal(k2, (num_relations, D), D, num_relations),
        w_ent=xavier_normal(k3, (F, 1, K), 1 * K, F * K),   # Conv1d weight (O,I,K)
        w_rel=xavier_normal(k4, (F, 1, K), 1 * K, F * K),
        bn0=bn_default(1), bn1=bn_default(F), bn2=bn_default(F),
    )


def fold_bn_into_conv(w_conv, bn0, bn_out):
    """Fold bn0 (pre-conv, C=1) and bn_out (post-conv, C=F) into conv weight/bias."""
    g0, beta0, rm0, rv0 = bn0
    a0 = (g0 / jnp.sqrt(rv0 + BN_EPS))[0]
    c0 = (beta0 - rm0 * g0 / jnp.sqrt(rv0 + BN_EPS))[0]
    g1, beta1, rm1, rv1 = bn_out
    s1 = g1 / jnp.sqrt(rv1 + BN_EPS)          # (F,)
    t1 = beta1 - rm1 * s1                     # (F,)
    w2d = w_conv[:, 0, :]                     # (F, K)
    w_eff = (s1[:, None] * a0) * w2d
    b_eff = s1 * c0 * jnp.sum(w2d, axis=1) + t1
    return w_eff.astype(jnp.float32), b_eff.astype(jnp.float32)


def build_dense_weight(w_eff, b_eff, D, L):
    """Banded dense matrix so conv+flatten becomes x @ W_dense + b_row.

    W_dense[d, f*L + l] = w_eff[f, d - l] for 0 <= d-l < K, zero elsewhere.
    """
    F, K = w_eff.shape
    c = jnp.arange(F * L)
    fc = c // L                                        # (F*L,)
    lc = c % L                                         # (F*L,)
    d = jnp.arange(D)[:, None]                         # (D, 1)
    k = d - lc[None, :]                                # (D, F*L)
    valid = (k >= 0) & (k < K)
    W = jnp.where(valid, w_eff[fc[None, :], jnp.clip(k, 0, K - 1)], 0.0)
    b = jnp.repeat(b_eff, L)                           # (F*L,)
    return W.astype(jnp.float32), b.astype(jnp.float32)


def prepare_inference(params, e_tile_max=E_TILE_MAX):
    """One-time (outside the per-call jit) preprocessing:
    BN folding, banded dense weights, bf16/padded entity table."""
    D, K = EMBEDDING_DIM, KERNEL_SIZE
    L = D - K + 1
    w_ent_eff, b_ent_eff = fold_bn_into_conv(params['w_ent'], params['bn0'], params['bn1'])
    w_rel_eff, b_rel_eff = fold_bn_into_conv(params['w_rel'], params['bn0'], params['bn2'])
    W_ent, b_ent = build_dense_weight(w_ent_eff, b_ent_eff, D, L)   # (32,120),(120,)
    W_rel, b_rel = build_dense_weight(w_rel_eff, b_rel_eff, D, L)

    E = params['emb_e'].shape[0]
    e_tile = min(e_tile_max, _round_up(E, 128))
    E_pad = _round_up(E, e_tile)
    emb_e_bf16 = jnp.zeros((E_pad, D), jnp.bfloat16).at[:E].set(
        params['emb_e'].astype(jnp.bfloat16))

    return dict(
        emb_e=params['emb_e'],        # f32, only for the tiny e1 gather
        emb_rel=params['emb_rel'],
        W_ent=W_ent, b_ent=b_ent,
        W_rel=W_rel, b_rel=b_rel,
        emb_e_bf16=emb_e_bf16,
    )


# ================================ Forward ====================================
@jax.jit
def distmult_decompress_forward(prep, e1_idx, rel_idx):
    D = EMBEDDING_DIM
    emb_e = prep['emb_e']
    emb_rel = prep['emb_rel']
    W_ent, b_ent = prep['W_ent'], prep['b_ent']
    W_rel, b_rel = prep['W_rel'], prep['b_rel']
    emb_e_bf16 = prep['emb_e_bf16']

    B = e1_idx.shape[0]
    E = emb_e.shape[0]
    E_pad = emb_e_bf16.shape[0]
    e_tile = min(E_TILE_MAX, E_pad)          # divides E_pad by construction
    B_pad = max(8, _round_up(B, 8))

    # --- Query path (tiny; plain jnp inside the same jit) -------------------
    # dropout layers are identity in eval mode; BN is folded into W/b.
    e1_emb = jnp.take(emb_e, e1_idx.reshape(-1), axis=0)       # (B, 32)
    rel_emb = jnp.take(emb_rel, rel_idx.reshape(-1), axis=0)   # (B, 32)
    e1_dec = e1_emb @ W_ent + b_ent                            # (B, 120)
    rel_dec = rel_emb @ W_rel + b_rel                          # (B, 120)
    prod = e1_dec * rel_dec                                    # (B, 120)

    # Algebraic fold of the e2 decompress into the query:
    #   scores = prod @ (emb @ W_ent + b_ent)^T = P @ emb^T + c
    P = prod @ W_ent.T                                         # (B, 32)
    c = prod @ b_ent                                           # (B,)

    P_pad = jnp.zeros((B_pad, D), jnp.float32).at[:B].set(P).astype(jnp.bfloat16)
    c_pad = jnp.zeros((B_pad, 1), jnp.float32).at[:B, 0].set(c)

    # --- Heavy part: stream raw bf16 entity table through the Pallas kernel -
    pred_pad = score(P_pad, c_pad, emb_e_bf16, e_tile)         # (B_pad, E_pad)
    return pred_pad[:B, :E]


# ============================ Pure-JAX reference =============================
def reference_forward(params, e1_idx, rel_idx):
    eps = BN_EPS

    def bn(x, p):  # x: (N, C, L)
        g, b, rm, rv = p
        return ((x - rm[None, :, None]) / jnp.sqrt(rv[None, :, None] + eps)
                * g[None, :, None] + b[None, :, None])

    def conv1d(x, w):  # x: (N, 1, D), w: (F, 1, K) -> (N, F, D-K+1)
        return jax.lax.conv_general_dilated(
            x, w, window_strides=(1,), padding='VALID',
            dimension_numbers=('NCH', 'OIH', 'NCH'))

    B = e1_idx.shape[0]
    E = params['emb_e'].shape[0]
    e1_emb = params['emb_e'][e1_idx[:, 0]][:, None, :]
    rel_emb = params['emb_rel'][rel_idx[:, 0]][:, None, :]
    e1_emb = bn(e1_emb, params['bn0'])
    rel_emb = bn(rel_emb, params['bn0'])
    e1_dec = bn(conv1d(e1_emb, params['w_ent']), params['bn1']).reshape(B, -1)
    rel_dec = bn(conv1d(rel_emb, params['w_rel']), params['bn2']).reshape(B, -1)
    e2_emb = bn(params['emb_e'][:, None, :], params['bn0'])
    e2_dec = bn(conv1d(e2_emb, params['w_ent']), params['bn1']).reshape(E, -1)
    return jax.nn.sigmoid((e1_dec * rel_dec) @ e2_dec.T)


# ================================== Main =====================================
if __name__ == "__main__":
    num_entities, num_relations, bsz = 64, 16, 2

    key = jax.random.PRNGKey(0)
    kp, ke, kr = jax.random.split(key, 3)
    params = init_params(kp, num_entities, num_relations)

    # One-time model preparation (BN fold + bf16/padded entity table).
    prep = prepare_inference(params)

    e1 = jax.random.randint(ke, (bsz, 1), 0, num_entities, dtype=jnp.int32)
    rel = jax.random.randint(kr, (bsz, 1), 0, num_relations, dtype=jnp.int32)

    pred = distmult_decompress_forward(prep, e1, rel)
    pred = jax.block_until_ready(pred)

    assert pred.shape == (bsz, num_entities), pred.shape
    ref = reference_forward(params, e1, rel)
    assert jnp.allclose(pred, ref, atol=1e-3, rtol=1e-3), \
        float(jnp.max(jnp.abs(pred - ref)))

    print("KERNEL_OK")
</pallas_src>

<mosaic_0001>
module attributes {stable_mosaic.version = 11 : i64} {
  func.func @_score_kernel(%arg0: i32, %arg1: memref<8x32xbf16, #tpu.memory_space<vmem>>, %arg2: memref<8x1xf32, #tpu.memory_space<vmem>>, %arg3: memref<128x32xbf16, #tpu.memory_space<vmem>>, %arg4: memref<8x128xf32, #tpu.memory_space<vmem>>) attributes {dimension_semantics = [#tpu.dimension_semantics<parallel>], iteration_bounds = array<i64: 1>, scalar_prefetch = 0 : i64, scratch_operands = 0 : i64, tpu.core_type = #tpu.core_type<tc>, window_params = [{pipeline_mode = #tpu.pipeline_mode<synchronous>, transform_indices = @transform_0, window_bounds = array<i64: 8, 32>}, {pipeline_mode = #tpu.pipeline_mode<synchronous>, transform_indices = @transform_1, window_bounds = array<i64: 8, 1>}, {transform_indices = @transform_2, window_bounds = array<i64: 128, 32>}, {transform_indices = @transform_3, window_bounds = array<i64: 8, 128>}]} {
    %c0 = arith.constant 0 : index
    %c0_0 = arith.constant 0 : index
    %0 = vector.load %arg1[%c0, %c0_0] : memref<8x32xbf16, #tpu.memory_space<vmem>>, vector<8x32xbf16>
    %c0_1 = arith.constant 0 : index
    %c0_2 = arith.constant 0 : index
    %1 = vector.load %arg3[%c0_1, %c0_2] : memref<128x32xbf16, #tpu.memory_space<vmem>>, vector<128x32xbf16>
    %cst = arith.constant dense<0.000000e+00> : vector<8x128xf32>
    %2 = tpu.matmul %0, %1, %cst {dimension_numbers = #tpu.dot_dimension_numbers<[1], [1], [0], [0], [0, 0, 1, 0], [], []>} : vector<8x32xbf16>, vector<128x32xbf16>, vector<8x128xf32> -> vector<8x128xf32>
    %c0_3 = arith.constant 0 : index
    %c0_4 = arith.constant 0 : index
    %3 = vector.load %arg2[%c0_3, %c0_4] : memref<8x1xf32, #tpu.memory_space<vmem>>, vector<8x1xf32>
    %4 = vector.broadcast %3 : vector<8x1xf32> to vector<8x128xf32>
    %5 = arith.addf %2, %4 : vector<8x128xf32>
    %6 = arith.negf %5 : vector<8x128xf32>
    %7 = math.exp %6 : vector<8x128xf32>
    %cst_5 = arith.constant 1.000000e+00 : f32
    %8 = vector.broadcast %cst_5 : f32 to vector<8x128xf32>
    %9 = arith.addf %8, %7 : vector<8x128xf32>
    %10 = arith.divf %8, %9 : vector<8x128xf32>
    %c0_6 = arith.constant 0 : index
    %c0_7 = arith.constant 0 : index
    %11 = vector.load %arg4[%c0_6, %c0_7] : memref<8x128xf32, #tpu.memory_space<vmem>>, vector<8x128xf32>
    tpu.vector_store %arg4[%c0_6, %c0_7], %10 {strides = array<i32>} : memref<8x128xf32, #tpu.memory_space<vmem>>, vector<8x128xf32>,
    return
  }
  func.func @transform_0(%arg0: i32) -> (i32, i32) {
    %c0_i32 = arith.constant 0 : i32
    %c0_i32_0 = arith.constant 0 : i32
    %c0_i32_1 = arith.constant 0 : i32
    return %c0_i32, %c0_i32_0 : i32, i32
  }
  func.func @transform_1(%arg0: i32) -> (i32, i32) {
    %c0_i32 = arith.constant 0 : i32
    %c0_i32_0 = arith.constant 0 : i32
    %c0_i32_1 = arith.constant 0 : i32
    return %c0_i32, %c0_i32_0 : i32, i32
  }
  func.func @transform_2(%arg0: i32) -> (i32, i32) {
    %c0_i32 = arith.constant 0 : i32
    %c0_i32_0 = arith.constant 0 : i32
    return %arg0, %c0_i32 : i32, i32
  }
  func.func @transform_3(%arg0: i32) -> (i32, i32) {
    %c0_i32 = arith.constant 0 : i32
    %c0_i32_0 = arith.constant 0 : i32
    return %c0_i32, %arg0 : i32, i32
  }
}

</mosaic_0001>

<bundles_post_ra>
// kernel: distmult_decompress_forward.1
= control target key start
LH: loop header
LB: loop body
LE: loop exit
PB: predicated region body
PF: predicated region fallthrough
CT: control target
= control target key end

     0   :  { %vm77_vm0 = vcmask 261120   ;;  %v190_v11 = vmov 0   ;;  %s253_s2 = inlined_call_operand.vmem [shape: bf16[128,32], index: 2, kind: input, shape index: {}]   ;;  %s254_s1 = inlined_call_operand.vmem [shape: f32[8,1], index: 1, kind: input, shape index: {}]   ;;  %s255_s0 = inlined_call_operand.vmem [shape: bf16[8,32], index: 0, kind: input, shape index: {}]   ;;  %s256_s3 = inlined_call_operand.vmem [shape: f32[8,128], index: 3, kind: output, shape index: {}]  }
   0x1   :  { %v183_v0 = vld [vmem:[%s253_s2 + $0x38] sm:$0xff]  ;;  %v182_v2 = vld [vmem:[%s253_s2 + $0x30] sm:$0xff]  ;;  %v181_v4 = vld [vmem:[%s253_s2 + $0x28] sm:$0xff]  ;;  %185 = vset.pattern.permute.xlu0 %v190_v11 }
   0x2   :  { %v103_v1 = vsel %vm77_vm0, %v183_v0, 0  ;;  %v100_v3 = vsel %vm77_vm0, %v182_v2, 0  ;;  %v97_v5 = vsel %vm77_vm0, %v181_v4, 0  ;;  %v180_v6 = vld [vmem:[%s253_s2 + $0x20] sm:$0xff]  ;;  %v179_v8 = vld [vmem:[%s253_s2 + $0x18] sm:$0xff]  ;;  %v178_v12 = vld [vmem:[%s253_s2 + $0x10] sm:$0xff] }
   0x3   :  { %105 = vmatpush.bf16.xpose.msra.mxu0 %v103_v1  ;;  %v94_v7 = vsel %vm77_vm0, %v180_v6, 0  ;;  %v91_v9 = vsel %vm77_vm0, %v179_v8, 0  ;;  %v31_v10 = vld [vmem:[%s254_s1] sm:$0xff]  ;;  %v88_v13 = vsel %vm77_vm0, %v178_v12, 0  ;;  %v177_v14 = vld [vmem:[%s253_s2 + $0x8] sm:$0xff] }
   0x4   :  { %34 = vperm.xlu0 %185, %v31_v10   ;;  %v85_v15 = vsel %vm77_vm0, %v177_v14, 0  ;;  %v176_v16 = vld [vmem:[%s253_s2] sm:$0xff] }
   0x5   :  { %v82_v17 = vsel %vm77_vm0, %v176_v16, 0  ;;  %v14_v18 = vld [vmem:[%s255_s0] sm:$0xf] }
   0xb   :  { %106 = vmatpush.bf16.xpose.msra.mxu0 %v100_v3 }
  0x13   :  { %107 = vmatpush.bf16.xpose.msra.mxu0 %v97_v5 }
  0x1b   :  { %108 = vmatpush.bf16.xpose.msra.mxu0 %v94_v7 }
  0x23   :  { %109 = vmatpush.bf16.xpose.msra.mxu0 %v91_v9 }
  0x2b   :  { %110 = vmatpush.bf16.xpose.msra.mxu0 %v88_v13 }
  0x33   :  { %111 = vmatpush.bf16.xpose.msra.mxu0 %v85_v15 }
  0x3b   :  { %112 = vmatpush.bf16.xpose.msra.mxu0 %v82_v17 }
  0x42   :  { %174 = vmatmul.msk.bf16.vlgmr.msra.gmra.mxu0 %vm77_vm0, %v14_v18 }
  0x76   :  { %v35_v19 = vpop.permute.xlu0 %34 }
  0xbf   :  { %v114_v20 = vpop.f32.mrf.mxu0 }
  0xc0   :  { %v115_v21 = vadd.f32 %v114_v20, %v35_v19 }
  0xc2   :  { %v175_v22 = vmul.f32 -1.442695, %v115_v21 }
  0xc4   :  { %186 = vpow2.f32 %v175_v22 }
  0xc7   :  { %v116_v23 = vpop.f32.mrf.mxu0 }
  0xca   :  { %v187_v24 = vpop.eup %186 }
  0xcb   :  { %v121_v25 = vadd.f32 1.0, %v187_v24 }
  0xcd   :  { %188 = vrcp.f32 %v121_v25  ;;  %v133_v29 = vand.u32 2147483648, %v121_v25  ;;  %v131_v31 = vand.u32 2147483647, %v121_v25  ;;  %vm127_vm2 = vweird.f32 %v121_v25 }
  0xcf   :  { %v134_v33 = vor.u32 1.1754944e-38, %v133_v29  ;;  %vm132_vm4 = vcmp.eq.f32.partialorder %v131_v31, 8.507059e+37 }
  0xd3   :  { %v189_v26 = vpop.eup %188 }
  0xd4   :  { %v123_v27 = vmul.f32 %v189_v26, %v121_v25  ;;  %vm128_vm1 = vweird.f32 %v189_v26 }
  0xd5   :  { %vm129_vm3 = vmor %vm127_vm2, %vm128_vm1 }
  0xd6   :  { %v124_v28 = vsub.f32 1.0, %v123_v27 }
  0xd8   :  { %v125_v30 = vmul.f32 %v189_v26, %v124_v28 }
  0xda   :  { %v126_v32 = vadd.f32 %v189_v26, %v125_v30 }
  0xdc   :  { %v130_v34 = vsel %vm129_vm3, %v189_v26, %v126_v32 }
  0xdd   :  { %v135_v35 = vsel %vm132_vm4, %v134_v33, %v130_v34 }
  0xde   :  { %137 = vst [vmem:[%s256_s3] sm:$0xff] %v135_v35 }

</bundles_post_ra>
